<compile_context>
chip_gen: v7x
topology: tpu7x:2x2x1
jax: 0.10.0
libtpu: 0.0.40
codegen_flags: <defaults>
</compile_context>

<pallas_src>
import functools
import math

import numpy as np

import jax
import jax.numpy as jnp
from jax.experimental import pallas as pl
from jax.experimental.pallas import tpu as pltpu


def _shift_left(v, s):
    """result[:, p] = v[:, p + s] (circular; wrapped tail is never selected)."""
    return jnp.concatenate([v[:, s:], v[:, :s]], axis=1)


def _maxpool_kernel(x_ref, sel_ref, o_ref, *, k, row_w):
    # x_ref:   (tm, G*k*W)  -- G pooling bands per row, each band = k image rows of W
    # sel_ref: (G*k*W, G*wo) resident 0/1 compaction selector (block-diagonal)
    # o_ref:   (tm, G*wo)
    a = x_ref[...]

    # Horizontal in-window max: m[p] = max_{t<k} a[p + t]
    m = a
    for t in range(1, k):
        m = jnp.maximum(m, _shift_left(a, t))

    # Vertical in-window max: h[p] = max_{j<k} m[p + j*W]
    h = m
    for j in range(1, k):
        h = jnp.maximum(h, _shift_left(m, j * row_w))

    # h[b*k*W + o*k] now holds the full kxk window max of band b, output column o.
    # Compact those window origins into a lane-dense (tm, G*wo) block with a single
    # 0/1 selector matmul on the otherwise-idle MXU (exact for finite activations).
    out = jnp.dot(h, sel_ref[...], preferred_element_type=jnp.float32)
    o_ref[...] = out.astype(o_ref.dtype)


def _build_selector(g, k, row_w, wo, dtype):
    sel = np.zeros((g * k * row_w, g * wo), dtype=np.float32)
    for b in range(g):
        for o in range(wo):
            sel[b * k * row_w + o * k, b * wo + o] = 1.0
    return jnp.asarray(sel, dtype=dtype)


@functools.partial(jax.jit, static_argnames=("k",))
def maxpool2d(x, *, k=2):
    """Forward of MP: nn.MaxPool2d(kernel_size=k, stride=k) on NCHW input."""
    n, c, h, w = x.shape
    ho, wo = h // k, w // k
    if ho == 0 or wo == 0:
        raise ValueError("Pooling window larger than input (matches torch error).")

    # PyTorch MaxPool2d floors the output size: drop remainder rows/cols.
    # (Only non-divisible shapes pay this extra copy.)
    if (h % k) or (w % k):
        x = x[:, :, : ho * k, : wo * k]
    row_w = wo * k  # trimmed image-row width W

    orig_dtype = x.dtype
    if x.dtype not in (jnp.float32, jnp.bfloat16):
        x = x.astype(jnp.float32)
    cdtype = x.dtype

    r = n * c * ho                       # number of kxW pooling bands
    # Bands packed per kernel row so the output block is a multiple of 128 lanes.
    if wo >= 128:
        g = 1
    else:
        g = 128 // math.gcd(wo, 128)

    band_w = k * row_w
    rows = pl.cdiv(r, g)
    if r % g:
        # Pad to a whole number of packed rows (copy; only for awkward band counts).
        flat = x.reshape(r, band_w)
        flat = jnp.pad(flat, ((0, rows * g - r), (0, 0)))
        x_rows = flat.reshape(rows, g * band_w)
    else:
        x_rows = x.reshape(rows, g * band_w)   # zero-cost contiguous view

    in_w = g * band_w
    out_w = g * wo
    itemsize = x_rows.dtype.itemsize

    # Fixed large row tile (~2 MiB of input per block), multiple of 8, cdiv grid.
    # Double-buffered in+out blocks (~5.3 MiB f32) fit every generation's scoped
    # VMEM default, including v7x's smaller VMEM.
    tm = (2 * 1024 * 1024 // (in_w * itemsize)) // 8 * 8
    tm = max(8, min(4096, tm))
    if rows <= tm:
        tm = rows                          # block == full dim is always legal
    grid = (pl.cdiv(rows, tm),)

    sel = _build_selector(g, k, row_w, wo, cdtype)

    kernel = functools.partial(_maxpool_kernel, k=k, row_w=row_w)

    cost = pl.CostEstimate(
        flops=2 * rows * in_w * out_w,      # selector compaction matmul
        transcendentals=0,
        bytes_accessed=(rows * in_w + rows * out_w) * itemsize
        + sel.size * sel.dtype.itemsize,
    )

    out = pl.pallas_call(
        kernel,
        out_shape=jax.ShapeDtypeStruct((rows, out_w), cdtype),
        grid=grid,
        in_specs=[
            pl.BlockSpec((tm, in_w), lambda i: (i, 0)),
            pl.BlockSpec((in_w, out_w), lambda i: (0, 0)),   # resident selector
        ],
        out_specs=pl.BlockSpec((tm, out_w), lambda i: (i, 0)),
        compiler_params=pltpu.CompilerParams(
            dimension_semantics=("parallel",)),
        cost_estimate=cost,
    )(x_rows, sel)

    out = out.reshape(rows * g, wo)
    if rows * g != r:
        out = out[:r]
    return out.reshape(n, c, ho, wo).astype(orig_dtype)


def _reference_maxpool(x, k):
    n, c, h, w = x.shape
    return jnp.max(x.reshape(n, c, h // k, k, w // k, k), axis=(3, 5))


if __name__ == "__main__":
    key = jax.random.PRNGKey(0)

    # MP with default k=2 applied to a small NCHW feature map.
    N, C, H, W = 2, 4, 16, 16
    K = 2

    x = jax.random.normal(key, (N, C, H, W), dtype=jnp.float32)

    out = jax.block_until_ready(maxpool2d(x, k=K))

    ref = _reference_maxpool(x, K)
    assert out.shape == (N, C, H // K, W // K), out.shape
    assert jnp.allclose(out, ref, atol=1e-5, rtol=0.0), \
        float(jnp.max(jnp.abs(out - ref)))

    print("KERNEL_OK")
</pallas_src>

<mosaic_0001>
module attributes {stable_mosaic.version = 11 : i64} {
  func.func @_maxpool_kernel(%arg0: i32, %arg1: memref<4x512xf32, #tpu.memory_space<vmem>>, %arg2: memref<512x128xf32, #tpu.memory_space<vmem>>, %arg3: memref<4x128xf32, #tpu.memory_space<vmem>>) attributes {dimension_semantics = [#tpu.dimension_semantics<parallel>], iteration_bounds = array<i64: 1>, scalar_prefetch = 0 : i64, scratch_operands = 0 : i64, tpu.core_type = #tpu.core_type<tc>, window_params = [{transform_indices = @transform_0, window_bounds = array<i64: 4, 512>}, {pipeline_mode = #tpu.pipeline_mode<synchronous>, transform_indices = @transform_1, window_bounds = array<i64: 512, 128>}, {transform_indices = @transform_2, window_bounds = array<i64: 4, 128>}]} {
    %c0 = arith.constant 0 : index
    %c0_0 = arith.constant 0 : index
    %0 = vector.load %arg1[%c0, %c0_0] : memref<4x512xf32, #tpu.memory_space<vmem>>, vector<4x512xf32>
    %1 = vector.extract_strided_slice %0 {offsets = [0, 1], sizes = [4, 511], strides = [1, 1]} : vector<4x512xf32> to vector<4x511xf32>
    %2 = vector.extract_strided_slice %0 {offsets = [0, 0], sizes = [4, 1], strides = [1, 1]} : vector<4x512xf32> to vector<4x1xf32>
    %3 = tpu.concatenate %1, %2 in 1 : vector<4x511xf32>, vector<4x1xf32> -> vector<4x512xf32>
    %4 = arith.maximumf %0, %3 : vector<4x512xf32>
    %5 = vector.extract_strided_slice %4 {offsets = [0, 16], sizes = [4, 496], strides = [1, 1]} : vector<4x512xf32> to vector<4x496xf32>
    %6 = vector.extract_strided_slice %4 {offsets = [0, 0], sizes = [4, 16], strides = [1, 1]} : vector<4x512xf32> to vector<4x16xf32>
    %7 = tpu.concatenate %5, %6 in 1 : vector<4x496xf32>, vector<4x16xf32> -> vector<4x512xf32>
    %8 = arith.maximumf %4, %7 : vector<4x512xf32>
    %c0_1 = arith.constant 0 : index
    %c0_2 = arith.constant 0 : index
    %9 = vector.load %arg2[%c0_1, %c0_2] : memref<512x128xf32, #tpu.memory_space<vmem>>, vector<512x128xf32>
    %cst = arith.constant dense<0.000000e+00> : vector<4x128xf32>
    %10 = tpu.matmul %8, %9, %cst {dimension_numbers = #tpu.dot_dimension_numbers<[1], [0], [0], [1], [0, 0, 1, 1], [], []>} : vector<4x512xf32>, vector<512x128xf32>, vector<4x128xf32> -> vector<4x128xf32>
    %c0_3 = arith.constant 0 : index
    %c0_4 = arith.constant 0 : index
    %11 = vector.load %arg3[%c0_3, %c0_4] : memref<4x128xf32, #tpu.memory_space<vmem>>, vector<4x128xf32>
    tpu.vector_store %arg3[%c0_3, %c0_4], %10 {strides = array<i32>} : memref<4x128xf32, #tpu.memory_space<vmem>>, vector<4x128xf32>,
    return
  }
  func.func @transform_0(%arg0: i32) -> (i32, i32) {
    %c0_i32 = arith.constant 0 : i32
    %c0_i32_0 = arith.constant 0 : i32
    return %arg0, %c0_i32 : i32, i32
  }
  func.func @transform_1(%arg0: i32) -> (i32, i32) {
    %c0_i32 = arith.constant 0 : i32
    %c0_i32_0 = arith.constant 0 : i32
    %c0_i32_1 = arith.constant 0 : i32
    return %c0_i32, %c0_i32_0 : i32, i32
  }
  func.func @transform_2(%arg0: i32) -> (i32, i32) {
    %c0_i32 = arith.constant 0 : i32
    %c0_i32_0 = arith.constant 0 : i32
    return %arg0, %c0_i32 : i32, i32
  }
}

</mosaic_0001>

<bundles_post_ra>
// kernel: maxpool2d.1
= control target key start
LH: loop header
LB: loop body
LE: loop exit
PB: predicated region body
PF: predicated region fallthrough
CT: control target
= control target key end

     0   :  { %7 = vsyncpa [#allocation3], 0  ;;  %s460_s9 = smov [#allocation2]   ;;  %s517_s0 = inlined_call_operand.vmem [shape: f32[4,512], index: 0, kind: input, shape index: {}]   ;;  %s518_s1 = inlined_call_operand.hbm [shape: f32[512,128], index: 1, kind: input, shape index: {}]   ;;  %s519_s2 = inlined_call_operand.vmem [shape: f32[4,128], index: 2, kind: output, shape index: {}]  }
   0x1   :  { %s15_s10 = sshll.u32 %s460_s9, 4  ;;  %s436_s13 = scalar_lea.hbm %s518_s1, 8192  ;;  %s16_s10 = int_to_ptr.vmem [resolvable:$true] %s15_s10 }
   0x2   :  { %p437_p0 = scmp.ne.s32.totalorder %s518_s1, %s436_s13  ;;  %p440_p1 = scmp.lt.u32.totalorder %s436_s13, %s518_s1 }
   0x4   :  { %p442_p2 = pnand %p440_p1, %p437_p0 }
   0x6   :  { %445 = shalt.err (!%p442_p2)
}
   0x7   :  { %s446_s18 = scalar_lea.vmem %s16_s10, 8192  ;;  %p451_p4 = scmp.lt.s32.totalorder %s16_s10, %s16_s10 }
   0x8   :  { %p447_p3 = scmp.ne.s32.totalorder %s16_s10, %s446_s18  ;;  %p452_p5 = scmp.lt.s32.totalorder %s446_s18, %s446_s18 }
   0xa   :  { %p453_p6 = por %p452_p5, %p451_p4 }
   0xc   :  { %p454_p7 = pnand %p453_p6, %p447_p3 }
   0xe   :  { %457 = shalt.err (!%p454_p7)
}
   0xf   :  { %s461_s19 = smov 128   ;;  %s462_s20 = smov 8  }
  0x10   :  { %21 = dma.hbm_to_vmem [thread:$0]  %s518_s1, 8192, %s16_s10, [#allocation3], %s461_s19, %s461_s19, %s462_s20  }
  0x11   :  { %458 = dma.done.wait [#allocation3], 8192  }
  0x12   :  { %459 = vsyncadd [#allocation3], 4294959104  ;;  %v495_v0 = vld [vmem:[%s517_s0 + $0x8] sm:$0xff]  ;;  %v500_v1 = vld [vmem:[%s517_s0] sm:$0xff]  ;;  %s463_s27 = smov 127   ;;  %vm39_vm0 = vcmask 1039360  }
  0x13   :  { %35 = vrot.lane.b32.xlu1 %v495_v0, %s463_s27  ;;  %31 = vrot.lane.b32.xlu0 %v500_v1, %s463_s27  ;;  %v30_v2 = vcombine.high %v495_v0, %v495_v0  ;;  %v29_v3 = vcombine.high %v500_v1, %v500_v1  ;;  %v95_v4 = vld [vmem:[#allocation2 + $0x80] sm:$0xff]  ;;  %v96_v5 = vld [vmem:[#allocation2 + $0x88] sm:$0xff]  ;;  %v97_v15 = vld [vmem:[#allocation2 + $0x90] sm:$0xff]  ;;  %s464_s0 = smov 112   ;;  %vm65_vm1 = vcmask 916480  }
  0x14   :  { %v79_v6 = vld [vmem:[#allocation2] sm:$0xff]  ;;  %v365_v7 = vpack.c.bf16 %v96_v5, %v95_v4  ;;  %v80_v8 = vld [vmem:[#allocation2 + $0x8] sm:$0xff]  ;;  %v98_v17 = vld [vmem:[#allocation2 + $0x98] sm:$0xff] }
  0x15   :  { %v127_v9 = vld [vmem:[#allocation2 + $0x180] sm:$0xff]  ;;  %v128_v10 = vld [vmem:[#allocation2 + $0x188] sm:$0xff]  ;;  %v367_v11 = vpack.c.bf16 %v80_v8, %v79_v6  ;;  %v81_v18 = vld [vmem:[#allocation2 + $0x10] sm:$0xff]  ;;  %v369_v20 = vpack.c.bf16 %v98_v17, %v97_v15 }
  0x16   :  { %v397_v12 = vpack.c.bf16 %v128_v10, %v127_v9  ;;  %v111_v13 = vld [vmem:[#allocation2 + $0x100] sm:$0xff]  ;;  %v112_v14 = vld [vmem:[#allocation2 + $0x108] sm:$0xff]  ;;  %366 = vmatprep.subr.bf16.mxu0 %v365_v7  ;;  %v82_v19 = vld [vmem:[#allocation2 + $0x18] sm:$0xff] }
  0x17   :  { %37 = vrot.lane.b32.xlu1 %v30_v2, %s463_s27  ;;  %33 = vrot.lane.b32.xlu0 %v29_v3, %s463_s27  ;;  %v399_v16 = vpack.c.bf16 %v112_v14, %v111_v13  ;;  %v371_v21 = vpack.c.bf16 %v82_v19, %v81_v18  ;;  %v129_v22 = vld [vmem:[#allocation2 + $0x190] sm:$0xff]  ;;  %v130_v23 = vld [vmem:[#allocation2 + $0x198] sm:$0xff]  ;;  %v99_v27 = vld [vmem:[#allocation2 + $0xa0] sm:$0xff] }
  0x18   :  { %368 = vmatpush3.bf16.msra.mxu0 %v367_v11  ;;  %398 = vmatprep.subr.bf16.mxu1 %v397_v12  ;;  %v113_v24 = vld [vmem:[#allocation2 + $0x110] sm:$0xff]  ;;  %v401_v25 = vpack.c.bf16 %v130_v23, %v129_v22  ;;  %v114_v26 = vld [vmem:[#allocation2 + $0x118] sm:$0xff]  ;;  %v100_v28 = vld [vmem:[#allocation2 + $0xa8] sm:$0xff] }
  0x19   :  { %400 = vmatpush3.bf16.msra.mxu1 %v399_v16  ;;  %370 = vmatprep.subr.bf16.mxu0 %v369_v20  ;;  %v403_v29 = vpack.c.bf16 %v114_v26, %v113_v24  ;;  %v373_v30 = vpack.c.bf16 %v100_v28, %v99_v27  ;;  %v83_v31 = vld [vmem:[#allocation2 + $0x20] sm:$0xff]  ;;  %v84_v32 = vld [vmem:[#allocation2 + $0x28] sm:$0xff]  ;;  %v101_v39 = vld [vmem:[#allocation2 + $0xb0] sm:$0xff] }
  0x1a   :  { %v131_v33 = vld [vmem:[#allocation2 + $0x1a0] sm:$0xff]  ;;  %402 = vmatprep.subr.bf16.mxu1 %v401_v25  ;;  %v132_v34 = vld [vmem:[#allocation2 + $0x1a8] sm:$0xff]  ;;  %v375_v37 = vpack.c.bf16 %v84_v32, %v83_v31  ;;  %v102_v40 = vld [vmem:[#allocation2 + $0xb8] sm:$0xff] }
  0x1b   :  { %v115_v35 = vld [vmem:[#allocation2 + $0x120] sm:$0xff]  ;;  %v116_v36 = vld [vmem:[#allocation2 + $0x128] sm:$0xff]  ;;  %v405_v38 = vpack.c.bf16 %v132_v34, %v131_v33  ;;  %v85_v41 = vld [vmem:[#allocation2 + $0x30] sm:$0xff]  ;;  %v377_v43 = vpack.c.bf16 %v102_v40, %v101_v39 }
  0x1c   :  { %372 = vmatpush3.bf16.msra.mxu0 %v371_v21  ;;  %v407_v42 = vpack.c.bf16 %v116_v36, %v115_v35  ;;  %v86_v44 = vld [vmem:[#allocation2 + $0x38] sm:$0xff]  ;;  %v133_v45 = vld [vmem:[#allocation2 + $0x1b0] sm:$0xff]  ;;  %v103_v50 = vld [vmem:[#allocation2 + $0xc0] sm:$0xff] }
  0x1d   :  { %404 = vmatpush3.bf16.msra.mxu1 %v403_v29  ;;  %374 = vmatprep.subr.bf16.mxu0 %v373_v30  ;;  %v134_v46 = vld [vmem:[#allocation2 + $0x1b8] sm:$0xff]  ;;  %v117_v48 = vld [vmem:[#allocation2 + $0x130] sm:$0xff]  ;;  %v104_v51 = vld [vmem:[#allocation2 + $0xc8] sm:$0xff]  ;;  %v379_v52 = vpack.c.bf16 %v86_v44, %v85_v41 }
  0x1e   :  { %406 = vmatprep.subr.bf16.mxu1 %v405_v38  ;;  %v409_v47 = vpack.c.bf16 %v134_v46, %v133_v45  ;;  %v118_v49 = vld [vmem:[#allocation2 + $0x138] sm:$0xff]  ;;  %v135_v53 = vld [vmem:[#allocation2 + $0x1c0] sm:$0xff]  ;;  %v136_v54 = vld [vmem:[#allocation2 + $0x1c8] sm:$0xff]  ;;  %v381_v56 = vpack.c.bf16 %v104_v51, %v103_v50 }
  0x1f   :  { %v411_v55 = vpack.c.bf16 %v118_v49, %v117_v48  ;;  %v87_v57 = vld [vmem:[#allocation2 + $0x40] sm:$0xff]  ;;  %v88_v58 = vld [vmem:[#allocation2 + $0x48] sm:$0xff]  ;;  %v413_v59 = vpack.c.bf16 %v136_v54, %v135_v53  ;;  %v105_v2 = vld [vmem:[#allocation2 + $0xd0] sm:$0xff] }
  0x20   :  { %376 = vmatpush3.bf16.msra.mxu0 %v375_v37  ;;  %v119_v60 = vld [vmem:[#allocation2 + $0x140] sm:$0xff]  ;;  %v120_v61 = vld [vmem:[#allocation2 + $0x148] sm:$0xff]  ;;  %v383_v62 = vpack.c.bf16 %v88_v58, %v87_v57  ;;  %v106_v3 = vld [vmem:[#allocation2 + $0xd8] sm:$0xff] }
  0x21   :  { %408 = vmatpush3.bf16.msra.mxu1 %v407_v42  ;;  %378 = vmatprep.subr.bf16.mxu0 %v377_v43  ;;  %v415_v63 = vpack.c.bf16 %v120_v61, %v119_v60  ;;  %v385_v4 = vpack.c.bf16 %v106_v3, %v105_v2  ;;  %v89_v5 = vld [vmem:[#allocation2 + $0x50] sm:$0xff]  ;;  %v90_v6 = vld [vmem:[#allocation2 + $0x58] sm:$0xff]  ;;  %v107_v14 = vld [vmem:[#allocation2 + $0xe0] sm:$0xff] }
  0x22   :  { %410 = vmatprep.subr.bf16.mxu1 %v409_v47  ;;  %v387_v7 = vpack.c.bf16 %v90_v6, %v89_v5  ;;  %v137_v8 = vld [vmem:[#allocation2 + $0x1d0] sm:$0xff]  ;;  %v138_v9 = vld [vmem:[#allocation2 + $0x1d8] sm:$0xff]  ;;  %v108_v15 = vld [vmem:[#allocation2 + $0xe8] sm:$0xff] }
  0x23   :  { %v417_v10 = vpack.c.bf16 %v138_v9, %v137_v8  ;;  %v121_v11 = vld [vmem:[#allocation2 + $0x150] sm:$0xff]  ;;  %v122_v12 = vld [vmem:[#allocation2 + $0x158] sm:$0xff]  ;;  %v389_v16 = vpack.c.bf16 %v108_v15, %v107_v14  ;;  %v91_v17 = vld [vmem:[#allocation2 + $0x60] sm:$0xff] }
  0x24   :  { %380 = vmatpush3.bf16.msra.mxu0 %v379_v52  ;;  %v419_v13 = vpack.c.bf16 %v122_v12, %v121_v11  ;;  %v92_v18 = vld [vmem:[#allocation2 + $0x68] sm:$0xff]  ;;  %v139_v22 = vld [vmem:[#allocation2 + $0x1e0] sm:$0xff]  ;;  %v109_v28 = vld [vmem:[#allocation2 + $0xf0] sm:$0xff] }
  0x25   :  { %412 = vmatpush3.bf16.msra.mxu1 %v411_v55  ;;  %382 = vmatprep.subr.bf16.mxu0 %v381_v56  ;;  %v391_v21 = vpack.c.bf16 %v92_v18, %v91_v17  ;;  %v140_v23 = vld [vmem:[#allocation2 + $0x1e8] sm:$0xff]  ;;  %v123_v25 = vld [vmem:[#allocation2 + $0x160] sm:$0xff]  ;;  %v110_v29 = vld [vmem:[#allocation2 + $0xf8] sm:$0xff] }
  0x26   :  { %414 = vmatprep.subr.bf16.mxu1 %v413_v59  ;;  %v421_v24 = vpack.c.bf16 %v140_v23, %v139_v22  ;;  %v124_v26 = vld [vmem:[#allocation2 + $0x168] sm:$0xff]  ;;  %v393_v30 = vpack.c.bf16 %v110_v29, %v109_v28  ;;  %v93_v31 = vld [vmem:[#allocation2 + $0x70] sm:$0xff]  ;;  %v94_v32 = vld [vmem:[#allocation2 + $0x78] sm:$0xff] }
  0x27   :  { %v423_v27 = vpack.c.bf16 %v124_v26, %v123_v25  ;;  %v395_v35 = vpack.c.bf16 %v94_v32, %v93_v31  ;;  %v141_v36 = vld [vmem:[#allocation2 + $0x1f0] sm:$0xff]  ;;  %v142_v37 = vld [vmem:[#allocation2 + $0x1f8] sm:$0xff] }
  0x28   :  { %384 = vmatpush3.bf16.msra.mxu0 %v383_v62  ;;  %v125_v42 = vld [vmem:[#allocation2 + $0x170] sm:$0xff]  ;;  %v126_v43 = vld [vmem:[#allocation2 + $0x178] sm:$0xff]  ;;  %v425_v46 = vpack.c.bf16 %v142_v37, %v141_v36 }
  0x29   :  { %416 = vmatpush3.bf16.msra.mxu1 %v415_v63  ;;  %386 = vmatprep.subr.bf16.mxu0 %v385_v4  ;;  %v427_v47 = vpack.c.bf16 %v126_v43, %v125_v42 }
  0x2a   :  { %418 = vmatprep.subr.bf16.mxu1 %v417_v10 }
  0x2c   :  { %388 = vmatpush3.bf16.msra.mxu0 %v387_v7 }
  0x2d   :  { %420 = vmatpush3.bf16.msra.mxu1 %v419_v13  ;;  %390 = vmatprep.subr.bf16.mxu0 %v389_v16 }
  0x2e   :  { %422 = vmatprep.subr.bf16.mxu1 %v421_v24 }
  0x30   :  { %392 = vmatpush3.bf16.msra.mxu0 %v391_v21 }
  0x31   :  { %424 = vmatpush3.bf16.msra.mxu1 %v423_v27  ;;  %394 = vmatprep.subr.bf16.mxu0 %v393_v30 }
  0x32   :  { %426 = vmatprep.subr.bf16.mxu1 %v425_v46 }
  0x34   :  { %396 = vmatpush3.bf16.msra.mxu0 %v395_v35 }
  0x35   :  { %428 = vmatpush3.bf16.msra.mxu1 %v427_v47 }
  0x85   :  { %v36_v19 = vpop.permute.xlu1 %35  ;;  %v32_v20 = vpop.permute.xlu0 %31 }
  0x89   :  { %v38_v33 = vpop.permute.xlu1 %37  ;;  %v34_v34 = vpop.permute.xlu0 %33 }
  0x8a   :  { %v42_v38 = vsel %vm39_vm0, %v36_v19, %v38_v33  ;;  %v45_v39 = vsel %vm39_vm0, %v38_v33, %v32_v20  ;;  %v40_v40 = vsel %vm39_vm0, %v32_v20, %v34_v34  ;;  %v41_v41 = vsel %vm39_vm0, %v34_v34, %v36_v19 }
  0x8b   :  { %v48_v44 = vcombine.low %v42_v38, %v45_v39  ;;  %v47_v45 = vcombine.low %v40_v40, %v41_v41 }
  0x8d   :  { %v51_v48 = vmax.f32 %v500_v1, %v47_v45  ;;  %v52_v50 = vmax.f32 %v495_v0, %v48_v44 }
  0x8f   :  { %57 = vrot.lane.b32.xlu0 %v51_v48, %s464_s0  ;;  %v55_v49 = vcombine.high %v51_v48, %v51_v48  ;;  %v56_v51 = vcombine.high %v52_v50, %v52_v50 }
  0x91   :  { %59 = vrot.lane.b32.xlu1 %v55_v49, %s464_s0 }
  0x93   :  { %61 = vrot.lane.b32.xlu0 %v52_v50, %s464_s0 }
  0x95   :  { %63 = vrot.lane.b32.xlu1 %v56_v51, %s464_s0 }
 0x101   :  { %v58_v52 = vpop.permute.xlu0 %57 }
 0x103   :  { %v60_v53 = vpop.permute.xlu1 %59 }
 0x104   :  { %v66_v55 = vsel %vm65_vm1, %v58_v52, %v60_v53 }
 0x105   :  { %v62_v54 = vpop.permute.xlu0 %61 }
 0x106   :  { %v67_v56 = vsel %vm65_vm1, %v60_v53, %v62_v54 }
 0x107   :  { %v73_v57 = vcombine.low %v66_v55, %v67_v56  ;;  %v64_v58 = vpop.permute.xlu1 %63 }
 0x108   :  { %v68_v1 = vsel %vm65_vm1, %v62_v54, %v64_v58  ;;  %v71_v59 = vsel %vm65_vm1, %v64_v58, %v58_v52 }
 0x109   :  { %v74_v60 = vcombine.low %v68_v1, %v71_v59  ;;  %v77_v61 = vmax.f32 %v51_v48, %v73_v57 }
 0x10b   :  { %v145_v62 = vcombine.high %v77_v61, %v77_v61  ;;  %v78_v63 = vmax.f32 %v52_v50, %v74_v60 }
 0x10d   :  { %213 = vmatprep.mubr.f32.mxu0 %v145_v62  ;;  %v146_v0 = vcombine.high %v78_v63, %v78_v63 }
 0x10e   :  { %214 = vmatmul.mubr.f32.vlgmr.msra.gmra.mrb[0].mxu0 %v77_v61 }
 0x10f   :  { %283 = vmatprep.mubr.f32.mxu1 %v146_v0 }
 0x110   :  { %284 = vmatmul.mubr.f32.vlgmr.msra.gmra.mrb[0].mxu1 %v78_v63 }
 0x1e1   :  { %v327_v2 = vpop.f32.mrb[0].mxu0 }
 0x1e2   :  { %v328_v3 = vpop.f32.mrb[1].mxu0 }
 0x1e3   :  { %v329_v4 = vadd.f32 %v328_v3, %v327_v2  ;;  %v362_v5 = vpop.f32.mrb[0].mxu1 }
 0x1e4   :  { %v363_v6 = vpop.f32.mrb[1].mxu1 }
 0x1e5   :  { %v364_v7 = vadd.f32 %v363_v6, %v362_v5 }
 0x1e7   :  { %v286_v8 = vadd.f32 %v364_v7, %v329_v4 }
 0x1e9   :  { %289 = vst [vmem:[%s519_s2] sm:$0xf] %v286_v8 }
 0x1ea   :  { %294 = vsyncpa [#allocation3], 1 }

</bundles_post_ra>
